<compile_context>
chip_gen: v5e
topology: v5e:2x2
jax: 0.10.0
libtpu: 0.0.40
codegen_flags: <defaults>
</compile_context>

<pallas_src>
import functools

import jax
import jax.numpy as jnp
from jax.experimental import pallas as pl
from jax.experimental.pallas import tpu as pltpu


def _round_up(x: int, m: int) -> int:
    return ((x + m - 1) // m) * m


@functools.lru_cache(maxsize=1)
def _hw_info():
    """Returns (vmem_capacity_bytes, num_tensorcores_per_device, default row tile)."""
    vmem_cap = 64 << 20                          # conservative fallback (v7x)
    try:
        vmem_cap = int(pltpu.get_tpu_info().vmem_capacity_bytes)
    except Exception:
        pass
    kind = ""
    try:
        kind = jax.devices()[0].device_kind.lower()
    except Exception:
        pass
    num_tc = 2 if "v7" in kind else 1            # v7x: 2 TensorCores per chip
    # v6e: 128 MiB VMEM + fast MXU -> a larger row tile amortizes the ~0.35 us
    # grid-step overhead.  v5e keeps 512 (MXU time already dominates); v7x
    # keeps <=512 because of its 64 MiB VMEM.
    tm_default = 1024 if ("v6" in kind and vmem_cap >= (100 << 20)) else 512
    return vmem_cap, num_tc, tm_default


def _adapter_kernel(x_ref, w1_ref, b1_ref, w2_ref, b2_ref, o_ref):
    # x_ref : (TM, Din)   input dtype (bf16 cast happens here, once)
    # w1_ref: (Din, Dhid) bf16  (resident)    b1_ref: (1, Dhid) f32 (resident)
    # w2_ref: (Dhid, Dout) bf16 (resident)    b2_ref: (1, Dout) f32 (resident)
    # o_ref : (TM, Dout)  output dtype == input dtype
    x = x_ref[...].astype(jnp.bfloat16)
    h = jnp.dot(x, w1_ref[...], preferred_element_type=jnp.float32)
    h = jnp.maximum(h + b1_ref[...], 0.0)                 # bias + ReLU in f32 (VPU)
    y = jnp.dot(h.astype(jnp.bfloat16), w2_ref[...],
                preferred_element_type=jnp.float32) + b2_ref[...]
    o_ref[...] = y.astype(o_ref.dtype)


def prepare_adapter_params(w1, b1, w2, b2):
    """One-time weight preparation: pad feature dims to multiples of 128 and
    cast the weight matrices to bf16 (MXU operand dtype).  Reuse the result
    across forward calls so the weight pad/cast HBM traffic is not paid per
    call.  Weight layout is (in, out), i.e. the transpose of nn.Linear.weight.
    """
    D_in, D_hid = w1.shape
    D_hid2, D_out = w2.shape
    assert D_hid == D_hid2 and b1.shape == (D_hid,) and b2.shape == (D_out,)
    d_in_p, d_hid_p, d_out_p = (_round_up(d, 128) for d in (D_in, D_hid, D_out))

    def pad2(a, rows, cols):
        if a.shape != (rows, cols):
            a = jnp.pad(a, ((0, rows - a.shape[0]), (0, cols - a.shape[1])))
        return a

    w1_p = pad2(w1, d_in_p, d_hid_p).astype(jnp.bfloat16)
    w2_p = pad2(w2, d_hid_p, d_out_p).astype(jnp.bfloat16)

    b1_p = b1.astype(jnp.float32)
    if D_hid != d_hid_p:
        b1_p = jnp.pad(b1_p, (0, d_hid_p - D_hid))
    b1_p = b1_p.reshape(1, d_hid_p)

    b2_p = b2.astype(jnp.float32)
    if D_out != d_out_p:
        b2_p = jnp.pad(b2_p, (0, d_out_p - D_out))
    b2_p = b2_p.reshape(1, d_out_p)

    return {"w1": w1_p, "b1": b1_p, "w2": w2_p, "b2": b2_p,
            "dims": (D_in, D_hid, D_out)}


def _resident_spec(shape):
    """BlockSpec for an operand whose block index is constant across the grid.
    Single-buffer it when the installed JAX supports pipeline_mode."""
    idx = lambda i: (0, 0)
    buffered = getattr(pl, "Buffered", None)
    if buffered is not None:
        try:
            return pl.BlockSpec(shape, idx, pipeline_mode=buffered(1))
        except TypeError:
            pass
    return pl.BlockSpec(shape, idx)


def adapter_apply(x, params, *, tm=None):
    """Fused Linear->ReLU->Linear.  x: (B, D_in) or (B, T, D_in).
    Returns (B, T, D_out) in x.dtype (T == 1 for 2-D x, matching unsqueeze(1))."""
    D_in, D_hid, D_out = params["dims"]
    w1_p, b1_p, w2_p, b2_p = params["w1"], params["b1"], params["w2"], params["b2"]
    d_in_p, d_hid_p = w1_p.shape
    d_out_p = w2_p.shape[1]

    out_dtype = x.dtype
    if x.ndim == 2:
        x = x[:, None, :]                           # matches torch unsqueeze(1)
    B, T, _ = x.shape
    assert x.shape[-1] == D_in
    M = B * T

    vmem_cap, num_tc, tm_default = _hw_info()
    tm_target = tm_default if tm is None else tm

    # Balanced row tiles (minimise padded junk rows); on v7x make sure there
    # are at least 2 tiles so "parallel" can shard rows across both TCs.
    # TODO(synk): verify "parallel" shards across v7x's 2 TCs; if not, switch
    #             to pltpu.CORE_PARALLEL / an explicit core_map split.
    min_tiles = num_tc if M >= num_tc * 16 else 1
    n_tiles = max(pl.cdiv(M, tm_target), min_tiles)
    tm_sel = _round_up(pl.cdiv(M, n_tiles), 16)     # 16 = bf16 sublane pack

    x_isz = jnp.dtype(x.dtype).itemsize
    o_isz = jnp.dtype(out_dtype).itemsize

    def vmem_estimate(tm_):
        return (2 * tm_ * d_in_p * x_isz            # x tile, double-buffered
                + 2 * tm_ * d_out_p * o_isz         # out tile, double-buffered
                + d_in_p * d_hid_p * 2              # w1 (bf16, single-buffered)
                + d_hid_p * d_out_p * 2             # w2 (bf16, single-buffered)
                + (d_hid_p + d_out_p) * 4           # biases (f32)
                + tm_ * d_hid_p * (4 + 2)           # h: f32 + bf16 copy
                + tm_ * d_out_p * 4)                # y: f32

    budget = max(vmem_cap - (12 << 20), 16 << 20)   # leave compiler headroom
    while vmem_estimate(tm_sel) > budget and tm_sel > 16:
        tm_sel = _round_up(max(tm_sel // 2, 16), 16)

    grid_m = pl.cdiv(M, tm_sel)
    m_pad = grid_m * tm_sel

    # Per-call x handling: pad only when necessary; the bf16 cast for the MXU
    # happens once, inside the kernel (no f32 round-trip, no extra HBM pass).
    x2d = x.reshape(M, D_in)
    if (m_pad, d_in_p) != (M, D_in):
        x2d = jnp.pad(x2d, ((0, m_pad - M), (0, d_in_p - D_in)))

    flops = 2 * m_pad * (d_in_p * d_hid_p + d_hid_p * d_out_p)
    bytes_accessed = (m_pad * d_in_p * x_isz
                      + (d_in_p * d_hid_p + d_hid_p * d_out_p) * 2
                      + (d_hid_p + d_out_p) * 4
                      + m_pad * d_out_p * o_isz)
    cost = pl.CostEstimate(flops=flops, transcendentals=0,
                           bytes_accessed=bytes_accessed)

    vmem_limit = int(min(max(int(vmem_estimate(tm_sel) * 1.3) + (4 << 20), 16 << 20),
                         budget))

    out_p = pl.pallas_call(
        _adapter_kernel,
        out_shape=jax.ShapeDtypeStruct((m_pad, d_out_p), out_dtype),
        grid=(grid_m,),
        in_specs=[
            pl.BlockSpec((tm_sel, d_in_p), lambda i: (i, 0)),   # x row tile
            _resident_spec((d_in_p, d_hid_p)),                  # w1
            _resident_spec((1, d_hid_p)),                       # b1
            _resident_spec((d_hid_p, d_out_p)),                 # w2
            _resident_spec((1, d_out_p)),                       # b2
        ],
        out_specs=pl.BlockSpec((tm_sel, d_out_p), lambda i: (i, 0)),
        compiler_params=pltpu.CompilerParams(
            dimension_semantics=("parallel",),
            vmem_limit_bytes=vmem_limit,
        ),
        cost_estimate=cost,
    )(x2d, w1_p, b1_p, w2_p, b2_p)

    if (m_pad, d_out_p) != (M, D_out):
        out_p = out_p[:M, :D_out]
    return out_p.reshape(B, T, D_out)


def mammal_to_llama_adapter(x, w1, b1, w2, b2, *, tm=None):
    """One-shot convenience wrapper (re-prepares the weights each call).
    Prefer prepare_adapter_params(...) once + adapter_apply(...) per call."""
    return adapter_apply(x, prepare_adapter_params(w1, b1, w2, b2), tm=tm)


def _reference(x, w1, b1, w2, b2, compute_dtype=jnp.float32):
    """Plain-JAX reference; compute_dtype=bfloat16 mirrors the kernel's MXU numerics."""
    if x.ndim == 2:
        x = x[:, None, :]
    h = jnp.dot(x.astype(compute_dtype), w1.astype(compute_dtype),
                preferred_element_type=jnp.float32) + b1.astype(jnp.float32)
    h = jnp.maximum(h, 0.0)
    y = jnp.dot(h.astype(compute_dtype), w2.astype(compute_dtype),
                preferred_element_type=jnp.float32) + b2.astype(jnp.float32)
    return y


if __name__ == "__main__":
    # Small shapes consistent with the module; ragged D_in (96) exercises the
    # lane-padding path, D_hid/D_out are already lane-aligned.
    batch = 2
    input_dim, hidden_dim, target_dim = 96, 128, 256

    key = jax.random.PRNGKey(0)
    k_x2, k_x3, kw1, kb1, kw2, kb2 = jax.random.split(key, 6)
    x2 = jax.random.normal(k_x2, (batch, input_dim), jnp.float32)        # 2-D path
    x3 = jax.random.normal(k_x3, (batch, 3, input_dim), jnp.float32)     # 3-D path
    w1 = jax.random.normal(kw1, (input_dim, hidden_dim), jnp.float32) * (1.0 / input_dim ** 0.5)
    b1 = jax.random.normal(kb1, (hidden_dim,), jnp.float32) * 0.01
    w2 = jax.random.normal(kw2, (hidden_dim, target_dim), jnp.float32) * (1.0 / hidden_dim ** 0.5)
    b2 = jax.random.normal(kb2, (target_dim,), jnp.float32) * 0.01

    params = prepare_adapter_params(w1, b1, w2, b2)      # one-time weight prep

    out2 = jax.block_until_ready(adapter_apply(x2, params))
    out3 = jax.block_until_ready(adapter_apply(x3, params))
    assert out2.shape == (batch, 1, target_dim), out2.shape
    assert out2.dtype == jnp.float32, out2.dtype          # f32 in -> f32 out
    assert out3.shape == (batch, 3, target_dim), out3.shape

    # Primary check: bf16-operand reference (same rounding / f32 accumulation
    # as the MXU path inside the kernel).
    ref2_bf16 = _reference(x2, w1, b1, w2, b2, compute_dtype=jnp.bfloat16)
    ref3_bf16 = _reference(x3, w1, b1, w2, b2, compute_dtype=jnp.bfloat16)
    assert jnp.allclose(out2, ref2_bf16, atol=2e-3, rtol=2e-3), "mismatch vs bf16 reference (2-D)"
    assert jnp.allclose(out3, ref3_bf16, atol=2e-3, rtol=2e-3), "mismatch vs bf16 reference (3-D)"

    # Sanity check against the full-f32 reference (bounds the bf16 cast error).
    ref2_f32 = _reference(x2, w1, b1, w2, b2, compute_dtype=jnp.float32)
    assert jnp.allclose(out2, ref2_f32, atol=5e-2, rtol=5e-2), "bf16 error vs f32 reference too large"

    # bf16 input -> bf16 output emitted directly from the kernel (no external cast).
    x2_bf = x2.astype(jnp.bfloat16)
    out2_bf = jax.block_until_ready(adapter_apply(x2_bf, params))
    assert out2_bf.dtype == jnp.bfloat16 and out2_bf.shape == (batch, 1, target_dim)
    ref2_bf_in = _reference(x2_bf, w1, b1, w2, b2, compute_dtype=jnp.bfloat16)
    assert jnp.allclose(out2_bf.astype(jnp.float32), ref2_bf_in, atol=3e-2, rtol=3e-2), \
        "mismatch vs reference (bf16 input)"

    print("KERNEL_OK")
</pallas_src>

<mosaic_0001>
module attributes {stable_mosaic.version = 11 : i64} {
  func.func @_adapter_kernel(%arg0: i32, %arg1: memref<16x128xf32, #tpu.memory_space<vmem>>, %arg2: memref<128x128xbf16, #tpu.memory_space<vmem>>, %arg3: memref<1x128xf32, #tpu.memory_space<vmem>>, %arg4: memref<128x256xbf16, #tpu.memory_space<vmem>>, %arg5: memref<1x256xf32, #tpu.memory_space<vmem>>, %arg6: memref<16x256xf32, #tpu.memory_space<vmem>>) attributes {dimension_semantics = [#tpu.dimension_semantics<parallel>], iteration_bounds = array<i64: 1>, scalar_prefetch = 0 : i64, scratch_operands = 0 : i64, tpu.core_type = #tpu.core_type<tc>, window_params = [{transform_indices = @transform_0, window_bounds = array<i64: 16, 128>}, {pipeline_mode = #tpu.pipeline_mode<synchronous>, transform_indices = @transform_1, window_bounds = array<i64: 128, 128>}, {pipeline_mode = #tpu.pipeline_mode<synchronous>, transform_indices = @transform_2, window_bounds = array<i64: 1, 128>}, {pipeline_mode = #tpu.pipeline_mode<synchronous>, transform_indices = @transform_3, window_bounds = array<i64: 128, 256>}, {pipeline_mode = #tpu.pipeline_mode<synchronous>, transform_indices = @transform_4, window_bounds = array<i64: 1, 256>}, {transform_indices = @transform_5, window_bounds = array<i64: 16, 256>}]} {
    %c0 = arith.constant 0 : index
    %c0_0 = arith.constant 0 : index
    %0 = vector.load %arg1[%c0, %c0_0] : memref<16x128xf32, #tpu.memory_space<vmem>>, vector<16x128xf32>
    %1 = arith.truncf %0 : vector<16x128xf32> to vector<16x128xbf16>
    %c0_1 = arith.constant 0 : index
    %c0_2 = arith.constant 0 : index
    %2 = vector.load %arg2[%c0_1, %c0_2] : memref<128x128xbf16, #tpu.memory_space<vmem>>, vector<128x128xbf16>
    %cst = arith.constant dense<0.000000e+00> : vector<16x128xf32>
    %3 = tpu.matmul %1, %2, %cst {dimension_numbers = #tpu.dot_dimension_numbers<[1], [0], [0], [1], [0, 0, 1, 1], [], []>} : vector<16x128xbf16>, vector<128x128xbf16>, vector<16x128xf32> -> vector<16x128xf32>
    %c0_3 = arith.constant 0 : index
    %c0_4 = arith.constant 0 : index
    %4 = vector.load %arg3[%c0_3, %c0_4] : memref<1x128xf32, #tpu.memory_space<vmem>>, vector<1x128xf32>
    %5 = vector.broadcast %4 : vector<1x128xf32> to vector<16x128xf32>
    %6 = arith.addf %3, %5 : vector<16x128xf32>
    %cst_5 = arith.constant 0.000000e+00 : f32
    %7 = vector.broadcast %cst_5 : f32 to vector<16x128xf32>
    %8 = arith.maximumf %6, %7 : vector<16x128xf32>
    %9 = arith.truncf %8 : vector<16x128xf32> to vector<16x128xbf16>
    %c0_6 = arith.constant 0 : index
    %c0_7 = arith.constant 0 : index
    %10 = vector.load %arg4[%c0_6, %c0_7] : memref<128x256xbf16, #tpu.memory_space<vmem>>, vector<128x256xbf16>
    %cst_8 = arith.constant dense<0.000000e+00> : vector<16x256xf32>
    %11 = tpu.matmul %9, %10, %cst_8 {dimension_numbers = #tpu.dot_dimension_numbers<[1], [0], [0], [1], [0, 0, 1, 1], [], []>} : vector<16x128xbf16>, vector<128x256xbf16>, vector<16x256xf32> -> vector<16x256xf32>
    %c0_9 = arith.constant 0 : index
    %c0_10 = arith.constant 0 : index
    %12 = vector.load %arg5[%c0_9, %c0_10] : memref<1x256xf32, #tpu.memory_space<vmem>>, vector<1x256xf32>
    %13 = vector.broadcast %12 : vector<1x256xf32> to vector<16x256xf32>
    %14 = arith.addf %11, %13 : vector<16x256xf32>
    %c0_11 = arith.constant 0 : index
    %c0_12 = arith.constant 0 : index
    %15 = vector.load %arg6[%c0_11, %c0_12] : memref<16x256xf32, #tpu.memory_space<vmem>>, vector<16x256xf32>
    tpu.vector_store %arg6[%c0_11, %c0_12], %14 {strides = array<i32>} : memref<16x256xf32, #tpu.memory_space<vmem>>, vector<16x256xf32>,
    return
  }
  func.func @transform_0(%arg0: i32) -> (i32, i32) {
    %c0_i32 = arith.constant 0 : i32
    %c0_i32_0 = arith.constant 0 : i32
    return %arg0, %c0_i32 : i32, i32
  }
  func.func @transform_1(%arg0: i32) -> (i32, i32) {
    %c0_i32 = arith.constant 0 : i32
    %c0_i32_0 = arith.constant 0 : i32
    %c0_i32_1 = arith.constant 0 : i32
    return %c0_i32, %c0_i32_0 : i32, i32
  }
  func.func @transform_2(%arg0: i32) -> (i32, i32) {
    %c0_i32 = arith.constant 0 : i32
    %c0_i32_0 = arith.constant 0 : i32
    %c0_i32_1 = arith.constant 0 : i32
    return %c0_i32, %c0_i32_0 : i32, i32
  }
  func.func @transform_3(%arg0: i32) -> (i32, i32) {
    %c0_i32 = arith.constant 0 : i32
    %c0_i32_0 = arith.constant 0 : i32
    %c0_i32_1 = arith.constant 0 : i32
    return %c0_i32, %c0_i32_0 : i32, i32
  }
  func.func @transform_4(%arg0: i32) -> (i32, i32) {
    %c0_i32 = arith.constant 0 : i32
    %c0_i32_0 = arith.constant 0 : i32
    %c0_i32_1 = arith.constant 0 : i32
    return %c0_i32, %c0_i32_0 : i32, i32
  }
  func.func @transform_5(%arg0: i32) -> (i32, i32) {
    %c0_i32 = arith.constant 0 : i32
    %c0_i32_0 = arith.constant 0 : i32
    return %arg0, %c0_i32 : i32, i32
  }
}

</mosaic_0001>

<bundles_post_ra>
// kernel: tpu_custom_call.1
= control target key start
LH: loop header
LB: loop body
LE: loop exit
PB: predicated region body
PF: predicated region fallthrough
CT: control target
= control target key end

     0   :  { %10 = vsyncpa [#allocation3], 0  ;;  %s601_s0 = inlined_call_operand.hbm [shape: f32[16,128], index: 0, kind: input, shape index: {}]   ;;  %s602_s1 = inlined_call_operand.hbm [shape: bf16[128,128], index: 1, kind: input, shape index: {}]   ;;  %s603_s2 = inlined_call_operand.vmem [shape: f32[1,128], index: 2, kind: input, shape index: {}]   ;;  %s604_s3 = inlined_call_operand.hbm [shape: bf16[128,256], index: 3, kind: input, shape index: {}]   ;;  %s605_s4 = inlined_call_operand.vmem [shape: f32[1,256], index: 4, kind: input, shape index: {}]   ;;  %s606_s5 = inlined_call_operand.hbm [shape: f32[16,256], index: 5, kind: output, shape index: {}]  }
   0x1   :  { %11 = vsyncpa [#allocation6], 0  ;;  %s30_s20 = sshll.u32 %s602_s1, 4  ;;  %s31_s20 = int_to_ptr.hbm [resolvable:$true] %s30_s20 }
   0x2   :  { %12 = vsyncpa [#allocation4], 0  ;;  %s543_s21 = smov [#allocation5]   ;;  %s17_s25 = sshll.u32 %s601_s0, 4  ;;  %s18_s25 = int_to_ptr.hbm [resolvable:$true] %s17_s25 }
   0x3   :  { %s32_s22 = sshll.u32 %s543_s21, 4  ;;  %s544_s26 = smov 64   ;;  %s33_s22 = int_to_ptr.vmem [resolvable:$true] %s32_s22 }
   0x4   :  { %s545_s27 = smov 4   ;;  %s546_s28 = smov [#allocation2]  }
   0x5   :  { %38 = dma.hbm_to_vmem [thread:$0]  %s31_s20, 1024, %s33_s22, [#allocation6], %s544_s26, %s544_s26, %s545_s27  }
   0x6   :  { %s19_s29 = sshll.u32 %s546_s28, 4  ;;  %s547_s30 = smov 128   ;;  %s20_s29 = int_to_ptr.vmem [resolvable:$true] %s19_s29 }
   0x7   :  { %s548_s6 = smov 8   ;;  %s45_s8 = sshll.u32 %s604_s3, 4  ;;  %s46_s8 = int_to_ptr.hbm [resolvable:$true] %s45_s8 }
   0x8   :  { %25 = dma.hbm_to_vmem [thread:$0]  %s18_s25, 256, %s20_s29, [#allocation3], %s547_s30, %s547_s30, %s548_s6  }
   0x9   :  { %s549_s9 = smov [#allocation7]  }
   0xa   :  { %s47_s10 = sshll.u32 %s549_s9, 4  ;;  %s48_s10 = int_to_ptr.vmem [resolvable:$true] %s47_s10 }
   0xb   :  { %53 = dma.hbm_to_vmem [thread:$0]  %s46_s8, 2048, %s48_s10, [#allocation6], %s547_s30, %s547_s30, %s548_s6  }
   0xc   :  { %537 = dma.done.wait [#allocation3], 256  }
   0xd   :  { %538 = vsyncadd [#allocation3], 4294967040 }
   0xe   :  { %539 = dma.done.wait [#allocation6], 3072  }
   0xf   :  { %540 = vsyncadd [#allocation6], 4294964224  ;;  %v413_v0 = vld [vmem:[#allocation5 + $0x38] sm:$0xff]  ;;  %v412_v1 = vld [vmem:[#allocation5 + $0x30] sm:$0xff]  ;;  %s296_s16 = sshll.u32 %s606_s5, 4  ;;  %s552_s17 = smov 16   ;;  %s297_s16 = int_to_ptr.hbm [resolvable:$true] %s296_s16 }
  0x10   :  { %139 = vmatpush.bf16.msra.mxu0 %v413_v0  ;;  %v400_v2 = vld [vmem:[#allocation7 + $0x70] sm:$0xf]  ;;  %v429_v3 = vld [vmem:[#allocation7 + $0x74] sm:$0xf0]  ;;  %v428_v5 = vld [vmem:[#allocation7 + $0x74] sm:$0xf] }
  0x11   :  { %v401_v4 = vor.u32 %v429_v3, %v400_v2  ;;  %v402_v6 = vld [vmem:[#allocation7 + $0x78] sm:$0xf0]  ;;  %v392_v7 = vld [vmem:[#allocation7 + $0x60] sm:$0xf]  ;;  %v427_v9 = vld [vmem:[#allocation7 + $0x64] sm:$0xf0] }
  0x12   :  { %v405_v8 = vor.u32 %v428_v5, %v402_v6  ;;  %v426_v10 = vld [vmem:[#allocation7 + $0x64] sm:$0xf]  ;;  %v394_v11 = vld [vmem:[#allocation7 + $0x68] sm:$0xf0]  ;;  %v393_v13 = vor.u32 %v427_v9, %v392_v7  ;;  %v384_v15 = vld [vmem:[#allocation7 + $0x50] sm:$0xf] }
  0x13   :  { %v411_v12 = vld [vmem:[#allocation5 + $0x28] sm:$0xff]  ;;  %258 = vmatpush.bf16.msra.mxu1 %v401_v4  ;;  %v397_v14 = vor.u32 %v426_v10, %v394_v11  ;;  %v425_v16 = vld [vmem:[#allocation7 + $0x54] sm:$0xf0]  ;;  %v424_v17 = vld [vmem:[#allocation7 + $0x54] sm:$0xf] }
  0x14   :  { %140 = vmatpush.bf16.msra.mxu0 %v412_v1  ;;  %272 = vmatpush.bf16.msra.mxu2 %v405_v8  ;;  %v386_v18 = vld [vmem:[#allocation7 + $0x58] sm:$0xf0]  ;;  %v410_v19 = vld [vmem:[#allocation5 + $0x20] sm:$0xff]  ;;  %v385_v20 = vor.u32 %v425_v16, %v384_v15  ;;  %v423_v23 = vld [vmem:[#allocation7 + $0x44] sm:$0xf0] }
  0x15   :  { %v389_v21 = vor.u32 %v424_v17, %v386_v18  ;;  %v376_v22 = vld [vmem:[#allocation7 + $0x40] sm:$0xf]  ;;  %v422_v24 = vld [vmem:[#allocation7 + $0x44] sm:$0xf]  ;;  %v378_v25 = vld [vmem:[#allocation7 + $0x48] sm:$0xf0] }
  0x16   :  { %v409_v26 = vld [vmem:[#allocation5 + $0x18] sm:$0xff]  ;;  %v377_v27 = vor.u32 %v423_v23, %v376_v22  ;;  %v381_v28 = vor.u32 %v422_v24, %v378_v25  ;;  %v408_v29 = vld [vmem:[#allocation5 + $0x10] sm:$0xff]  ;;  %v407_v30 = vld [vmem:[#allocation5 + $0x8] sm:$0xff] }
  0x17   :  { %259 = vmatpush.bf16.msra.mxu1 %v393_v13  ;;  %v406_v31 = vld [vmem:[#allocation5] sm:$0xff]  ;;  %v68_v32 = vld [vmem:[#allocation2] sm:$0xff]  ;;  %v69_v33 = vld [vmem:[#allocation2 + $0x8] sm:$0xff] }
  0x18   :  { %141 = vmatpush.bf16.msra.mxu0 %v411_v12  ;;  %273 = vmatpush.bf16.msra.mxu2 %v397_v14  ;;  %v70_v34 = vpack.c.bf16 %v69_v33, %v68_v32  ;;  %v368_v35 = vld [vmem:[#allocation7 + $0x30] sm:$0xf]  ;;  %v421_v36 = vld [vmem:[#allocation7 + $0x34] sm:$0xf0]  ;;  %v420_v37 = vld [vmem:[#allocation7 + $0x34] sm:$0xf] }
  0x19   :  { %v369_v38 = vor.u32 %v421_v36, %v368_v35  ;;  %v370_v39 = vld [vmem:[#allocation7 + $0x38] sm:$0xf0]  ;;  %v360_v41 = vld [vmem:[#allocation7 + $0x20] sm:$0xf]  ;;  %v419_v42 = vld [vmem:[#allocation7 + $0x24] sm:$0xf0] }
  0x1a   :  { %v373_v40 = vor.u32 %v420_v37, %v370_v39  ;;  %v418_v43 = vld [vmem:[#allocation7 + $0x24] sm:$0xf]  ;;  %v361_v44 = vor.u32 %v419_v42, %v360_v41  ;;  %v362_v45 = vld [vmem:[#allocation7 + $0x28] sm:$0xf0]  ;;  %v352_v47 = vld [vmem:[#allocation7 + $0x10] sm:$0xf] }
  0x1b   :  { %260 = vmatpush.bf16.msra.mxu1 %v385_v20  ;;  %v365_v46 = vor.u32 %v418_v43, %v362_v45  ;;  %v417_v48 = vld [vmem:[#allocation7 + $0x14] sm:$0xf0]  ;;  %v416_v49 = vld [vmem:[#allocation7 + $0x14] sm:$0xf]  ;;  %v354_v51 = vld [vmem:[#allocation7 + $0x18] sm:$0xf0] }
  0x1c   :  { %142 = vmatpush.bf16.msra.mxu0 %v410_v19  ;;  %274 = vmatpush.bf16.msra.mxu2 %v389_v21  ;;  %v353_v50 = vor.u32 %v417_v48, %v352_v47  ;;  %v357_v52 = vor.u32 %v416_v49, %v354_v51  ;;  %v344_v53 = vld [vmem:[#allocation7] sm:$0xf]  ;;  %v415_v54 = vld [vmem:[#allocation7 + $0x4] sm:$0xf0]  ;;  %v414_v55 = vld [vmem:[#allocation7 + $0x4] sm:$0xf] }
  0x1d   :  { %v345_v56 = vor.u32 %v415_v54, %v344_v53  ;;  %v346_v57 = vld [vmem:[#allocation7 + $0x8] sm:$0xf0]  ;;  %v440_v60 = vld [vmem:[%s603_s2] ss:$0 sm:$0xff]  ;;  %s550_s2 = smov [#allocation8]  }
  0x1e   :  { %v349_v58 = vor.u32 %v414_v55, %v346_v57  ;;  %v172_v3 = vld [vmem:[%s605_s4] sm:$0x3]  ;;  %s294_s13 = sshll.u32 %s550_s2, 4  ;;  %s551_s4 = smov 256   ;;  %s295_s13 = int_to_ptr.vmem [resolvable:$true] %s294_s13 }
  0x1f   :  { %261 = vmatpush.bf16.msra.mxu1 %v377_v27  ;;  %v174_v4 = vperm.slane %v172_v3, 0  ;;  %v175_v7 = vperm.slane %v172_v3, 1 }
  0x20   :  { %143 = vmatpush.bf16.msra.mxu0 %v409_v26  ;;  %275 = vmatpush.bf16.msra.mxu2 %v381_v28 }
  0x23   :  { %262 = vmatpush.bf16.msra.mxu1 %v369_v38 }
  0x24   :  { %144 = vmatpush.bf16.msra.mxu0 %v408_v29  ;;  %276 = vmatpush.bf16.msra.mxu2 %v373_v40 }
  0x27   :  { %263 = vmatpush.bf16.msra.mxu1 %v361_v44 }
  0x28   :  { %145 = vmatpush.bf16.msra.mxu0 %v407_v30  ;;  %277 = vmatpush.bf16.msra.mxu2 %v365_v46 }
  0x2b   :  { %264 = vmatpush.bf16.msra.mxu1 %v353_v50 }
  0x2c   :  { %146 = vmatpush.bf16.msra.mxu0 %v406_v31  ;;  %278 = vmatpush.bf16.msra.mxu2 %v357_v52 }
  0x2f   :  { %147 = vmatmul.bf16.vlgmr.msra.gmra.mxu0 %v70_v34  ;;  %265 = vmatpush.bf16.msra.mxu1 %v345_v56 }
  0x30   :  { %279 = vmatpush.bf16.msra.mxu2 %v349_v58 }
  0xac   :  { %v148_v59 = vpop.f32.mrf.mxu0 }
  0xad   :  { %v149_v61 = vadd.f32 %v440_v60, %v148_v59 }
  0xaf   :  { %v153_v0 = vmax.f32 %v149_v61, 0.0 }
  0xb4   :  { %v150_v62 = vpop.f32.mrf.mxu0 }
  0xb5   :  { %v151_v63 = vadd.f32 %v440_v60, %v150_v62 }
  0xb7   :  { %v154_v1 = vmax.f32 %v151_v63, 0.0 }
  0xb9   :  { %v155_v2 = vpack.c.bf16 %v154_v1, %v153_v0 }
  0xbb   :  { %266 = vmatmul.bf16.vlgmr.msra.gmra.mxu1 %v155_v2  ;;  %280 = vmatmul.bf16.vlgmr.msra.gmra.mxu2 %v155_v2 }
 0x138   :  { %v267_v5 = vpop.f32.mrf.mxu1 }
 0x139   :  { %v268_v6 = vadd.f32 %v267_v5, %v174_v4 }
 0x13b   :  { %286 = vst [vmem:[#allocation8] sm:$0xff] %v268_v6 }
 0x13e   :  { %v281_v8 = vpop.f32.mrf.mxu2 }
 0x13f   :  { %v282_v9 = vadd.f32 %v281_v8, %v175_v7 }
 0x140   :  { %v269_v10 = vpop.f32.mrf.mxu1 }
 0x141   :  { %287 = vst [vmem:[#allocation8 + $0x8] sm:$0xff] %v282_v9  ;;  %v270_v11 = vadd.f32 %v269_v10, %v174_v4 }
 0x143   :  { %288 = vst [vmem:[#allocation8 + $0x10] sm:$0xff] %v270_v11 }
 0x146   :  { %v283_v12 = vpop.f32.mrf.mxu2 }
 0x147   :  { %v284_v13 = vadd.f32 %v283_v12, %v175_v7 }
 0x149   :  { %289 = vst [vmem:[#allocation8 + $0x18] sm:$0xff] %v284_v13 }
 0x14a   :  { %302 = dma.vmem_to_hbm [thread:$0]  %s295_s13, 512, %s297_s16, [#allocation4], %s551_s4, %s551_s4, %s552_s17  }
 0x14b   :  { %541 = dma.done.wait [#allocation4], 512  }
 0x14c   :  { %542 = vsyncadd [#allocation4], 4294966784 }
 0x14d   :  { %307 = vsyncpa [#allocation3], 1 }
 0x14e   :  { %308 = vsyncpa [#allocation6], 1 }
 0x14f   :  { %309 = vsyncpa [#allocation4], 1 }

</bundles_post_ra>
